<compile_context>
chip_gen: v7x
topology: tpu7x:2x2x1
jax: 0.10.0
libtpu: 0.0.40
codegen_flags: <defaults>
</compile_context>

<pallas_src>
import jax
import jax.numpy as jnp
from jax import lax
from jax.experimental import pallas as pl
from jax.experimental.pallas import tpu as pltpu


def _round_up(x, m):
    return ((x + m - 1) // m) * m


# ----------------------------------------------------------------------------
# Fast path: embedding tables resident in VMEM, one-hot MXU gather.
# ----------------------------------------------------------------------------
def gmf_vmem_kernel(uid_ref, iid_ref,          # (1, 1, tile_b) int32 blocks (lane-dense ids)
                    u_tab_t_ref, i_tab_t_ref,  # (D, n_users), (D, n_items) resident in VMEM
                    w_ref,                     # (1, D) f32, resident in VMEM
                    out_ref):                  # (1, 1, tile_b) f32 block
    n_users = u_tab_t_ref.shape[1]
    n_items = i_tab_t_ref.shape[1]
    tile_b = out_ref.shape[-1]

    uids = uid_ref[0]                          # (1, tile_b) int32, batch on lanes
    iids = iid_ref[0]

    iota_u = lax.broadcasted_iota(jnp.int32, (n_users, tile_b), 0)
    iota_i = lax.broadcasted_iota(jnp.int32, (n_items, tile_b), 0)
    oh_u = (iota_u == uids).astype(u_tab_t_ref.dtype)      # (n_users, tile_b) one-hot
    oh_i = (iota_i == iids).astype(i_tab_t_ref.dtype)      # (n_items, tile_b)

    # Row gather as (D, n) @ (n, tile_b) MXU matmuls -> embeddings arrive with batch on
    # lanes, so everything downstream (VPU product, final matmul, store) is lane-dense.
    gu = jnp.dot(u_tab_t_ref[...], oh_u, preferred_element_type=jnp.float32)   # (D, tile_b)
    gi = jnp.dot(i_tab_t_ref[...], oh_i, preferred_element_type=jnp.float32)   # (D, tile_b)

    prod = gu * gi                                                              # VPU, f32
    logits = jnp.dot(w_ref[...], prod, preferred_element_type=jnp.float32)      # (1, tile_b)
    out_ref[0] = jax.nn.sigmoid(logits)                                         # unmasked store


# ----------------------------------------------------------------------------
# HBM path: large vocab -> per-row gather DMAs, double-buffered across grid steps,
# one counted wait per table per step.
# ----------------------------------------------------------------------------
def gmf_hbm_kernel(uid_ref, iid_ref,           # (B_pad,) int32 in SMEM (scalar prefetch)
                   u_tab_hbm, i_tab_hbm,       # (n_users, D), (n_items, D) left in HBM
                   w_ref,                      # (1, D) f32 resident in VMEM
                   out_ref,                    # (1, 1, tile_b) f32 block
                   u_buf, i_buf,               # (2, tile_b, D) VMEM double buffers
                   sems):                      # (2, 2) DMA semaphores [table, slot]
    t = pl.program_id(0)
    nt = pl.num_programs(0)
    tile_b = out_ref.shape[-1]
    parity = t % 2

    def issue(base, slot):
        # 8-row unrolled issue so SMEM id loads / address math / descriptor pushes pipeline.
        @pl.loop(0, tile_b // 8)
        def _(g):
            for j in range(8):
                r = g * 8 + j
                uid = uid_ref[base + r]
                iid = iid_ref[base + r]
                pltpu.make_async_copy(u_tab_hbm.at[pl.ds(uid, 1), :],
                                      u_buf.at[slot, pl.ds(r, 1), :],
                                      sems.at[0, slot]).start()
                pltpu.make_async_copy(i_tab_hbm.at[pl.ds(iid, 1), :],
                                      i_buf.at[slot, pl.ds(r, 1), :],
                                      sems.at[1, slot]).start()

    # Prologue: tile 0 into slot 0.
    @pl.when(t == 0)
    def _():
        issue(0, 0)

    # Prefetch tile t+1 into the other slot (static slot index per parity branch).
    @pl.when(jnp.logical_and(t + 1 < nt, parity == 0))
    def _():
        issue((t + 1) * tile_b, 1)

    @pl.when(jnp.logical_and(t + 1 < nt, parity == 1))
    def _():
        issue((t + 1) * tile_b, 0)

    def finish(slot):
        # One counted wait per table: tile_b row-DMAs all signal sems[table, slot]; a single
        # whole-buffer descriptor consumes the same total byte count (paged-attention idiom).
        pltpu.make_async_copy(u_buf.at[slot], u_buf.at[slot], sems.at[0, slot]).wait()
        pltpu.make_async_copy(i_buf.at[slot], i_buf.at[slot], sems.at[1, slot]).wait()

        # f32 product (required on v5e; negligible vs DMA cost elsewhere).
        u = u_buf[slot].astype(jnp.float32)
        it = i_buf[slot].astype(jnp.float32)
        prod = u * it                                                   # (tile_b, D) VPU
        # w (1, D) contracted against prod's D -> (1, tile_b): lane-dense logits/store.
        logits = lax.dot_general(w_ref[...], prod,
                                 dimension_numbers=(((1,), (1,)), ((), ())),
                                 preferred_element_type=jnp.float32)
        out_ref[0] = jax.nn.sigmoid(logits)

    @pl.when(parity == 0)
    def _():
        finish(0)

    @pl.when(parity == 1)
    def _():
        finish(1)


# ----------------------------------------------------------------------------
# Wrapper
# ----------------------------------------------------------------------------
def _tables_fit_vmem(n_users, n_items, D, itemsize):
    # Lane-padded footprint of the transposed tables, plus a row cap so the one-hot
    # gather matmul stays cheap. Conservative enough for v7x's 64 MiB per-TC VMEM.
    def padded_bytes(n):
        return _round_up(D, 8) * _round_up(n, 128) * itemsize
    table_bytes = padded_bytes(n_users) + padded_bytes(n_items)
    return max(n_users, n_items) <= 1024 and table_bytes <= 12 * 1024 * 1024


def gmf_forward(x, user_table, item_table, fc_weight, *, tile_b=512,
                force_hbm_gather=False):
    """x: (B, 2) int ids; user_table: (n_users, D); item_table: (n_items, D);
    fc_weight: (1, D) as in nn.Linear(D, 1, bias=False). Returns (B, 1) f32."""
    B = x.shape[0]
    n_users, D = user_table.shape
    n_items, D_i = item_table.shape
    assert D_i == D

    tile_b = max(8, min(tile_b, _round_up(B, 8)))
    tile_b = (tile_b // 8) * 8
    B_pad = _round_up(B, tile_b)
    num_tiles = B_pad // tile_b

    # Glue: split + clamp ids (matches jnp gather semantics; PyTorch nn.Embedding would
    # raise on out-of-range ids instead), pad batch to a whole number of tiles.
    uid = jnp.clip(x[:, 0].astype(jnp.int32), 0, n_users - 1)
    iid = jnp.clip(x[:, 1].astype(jnp.int32), 0, n_items - 1)
    uid = jnp.pad(uid, (0, B_pad - B))
    iid = jnp.pad(iid, (0, B_pad - B))
    w = fc_weight.astype(jnp.float32).reshape(1, D)

    use_fast = (not force_hbm_gather) and _tables_fit_vmem(
        n_users, n_items, D, user_table.dtype.itemsize)

    if use_fast:
        # ---------------- VMEM-resident fast path ----------------
        uid3 = uid.reshape(num_tiles, 1, tile_b)
        iid3 = iid.reshape(num_tiles, 1, tile_b)
        u_tab_t = user_table.T        # (D, n_users): batch/vocab on lanes inside kernel
        i_tab_t = item_table.T        # (D, n_items)

        out = pl.pallas_call(
            gmf_vmem_kernel,
            grid=(num_tiles,),
            in_specs=[
                pl.BlockSpec((1, 1, tile_b), lambda t: (t, 0, 0)),
                pl.BlockSpec((1, 1, tile_b), lambda t: (t, 0, 0)),
                pl.BlockSpec((D, n_users), lambda t: (0, 0)),   # resident across grid
                pl.BlockSpec((D, n_items), lambda t: (0, 0)),   # resident across grid
                pl.BlockSpec((1, D), lambda t: (0, 0)),
            ],
            out_specs=pl.BlockSpec((1, 1, tile_b), lambda t: (t, 0, 0)),
            out_shape=jax.ShapeDtypeStruct((num_tiles, 1, tile_b), jnp.float32),
            compiler_params=pltpu.CompilerParams(
                dimension_semantics=("parallel",),          # megacore-shardable
                vmem_limit_bytes=32 * 1024 * 1024,
            ),
        )(uid3, iid3, u_tab_t, i_tab_t, w)
    else:
        # ---------------- HBM gather path ----------------
        # TODO(synk): wrapper-side dedup of repeated ids per tile would cut redundant
        # row DMAs on skewed recsys batches (most valuable on v5e).
        grid_spec = pltpu.PrefetchScalarGridSpec(
            num_scalar_prefetch=2,
            grid=(num_tiles,),
            in_specs=[
                pl.BlockSpec(memory_space=pl.ANY),                     # user table in HBM
                pl.BlockSpec(memory_space=pl.ANY),                     # item table in HBM
                pl.BlockSpec((1, D), lambda t, uids, iids: (0, 0)),    # fc weight in VMEM
            ],
            out_specs=pl.BlockSpec((1, 1, tile_b), lambda t, uids, iids: (t, 0, 0)),
            scratch_shapes=[
                pltpu.VMEM((2, tile_b, D), user_table.dtype),   # double-buffered gathers
                pltpu.VMEM((2, tile_b, D), item_table.dtype),
                pltpu.SemaphoreType.DMA((2, 2)),                # [table, slot]
            ],
        )
        out = pl.pallas_call(
            gmf_hbm_kernel,
            grid_spec=grid_spec,
            out_shape=jax.ShapeDtypeStruct((num_tiles, 1, tile_b), jnp.float32),
            compiler_params=pltpu.CompilerParams(
                # Cross-grid-step double buffering carries VMEM/semaphore state between
                # iterations, so this axis must run sequentially on a single core.
                dimension_semantics=("arbitrary",),
                vmem_limit_bytes=32 * 1024 * 1024,
            ),
        )(uid, iid, user_table, item_table, w)

    return out.reshape(B_pad, 1)[:B]


def gmf_reference(x, user_table, item_table, fc_weight):
    u = user_table[x[:, 0]]
    i = item_table[x[:, 1]]
    return jax.nn.sigmoid((u * i) @ fc_weight.T)


if __name__ == "__main__":
    # Module config (synthetic, deterministic init -- no checkpoint loading)
    n_users = 16
    n_items = 16
    embedding_dim = 32
    B = 24

    key = jax.random.PRNGKey(0)
    k_u, k_i, k_w, k_uid, k_iid = jax.random.split(key, 5)

    # nn.Embedding default init ~ N(0, 1); nn.Linear weight small uniform.
    user_table = jax.random.normal(k_u, (n_users, embedding_dim), jnp.float32)
    item_table = jax.random.normal(k_i, (n_items, embedding_dim), jnp.float32)
    bound = 1.0 / (embedding_dim ** 0.5)
    fc_weight = jax.random.uniform(
        k_w, (1, embedding_dim), jnp.float32, minval=-bound, maxval=bound)

    user_ids = jax.random.randint(k_uid, (B,), 0, n_users, jnp.int32)
    item_ids = jax.random.randint(k_iid, (B,), 0, n_items, jnp.int32)
    x = jnp.stack([user_ids, item_ids], axis=1)   # (B, 2), like torch LongTensor input

    ref = gmf_reference(x, user_table, item_table, fc_weight)

    # 1) VMEM-resident fast path (tables fit comfortably in VMEM at these shapes).
    out_fast = jax.block_until_ready(gmf_forward(x, user_table, item_table, fc_weight))
    assert out_fast.shape == (B, 1), out_fast.shape
    assert jnp.allclose(out_fast, ref, atol=1e-5, rtol=1e-5), (out_fast, ref)

    # 2) HBM gather path, small tiles so the cross-step double buffer + counted waits
    #    are exercised over multiple grid steps (3 tiles).
    out_hbm = jax.block_until_ready(
        gmf_forward(x, user_table, item_table, fc_weight, tile_b=8,
                    force_hbm_gather=True))
    assert out_hbm.shape == (B, 1), out_hbm.shape
    assert jnp.allclose(out_hbm, ref, atol=1e-5, rtol=1e-5), (out_hbm, ref)

    print("KERNEL_OK")
</pallas_src>

<mosaic_0001>
module attributes {stable_mosaic.version = 11 : i64} {
  func.func @gmf_vmem_kernel(%arg0: i32, %arg1: memref<1x1x24xi32, #tpu.memory_space<vmem>>, %arg2: memref<1x1x24xi32, #tpu.memory_space<vmem>>, %arg3: memref<32x16xf32, #tpu.memory_space<vmem>>, %arg4: memref<32x16xf32, #tpu.memory_space<vmem>>, %arg5: memref<1x32xf32, #tpu.memory_space<vmem>>, %arg6: memref<1x1x24xf32, #tpu.memory_space<vmem>>) attributes {dimension_semantics = [#tpu.dimension_semantics<parallel>], iteration_bounds = array<i64: 1>, scalar_prefetch = 0 : i64, scratch_operands = 0 : i64, tpu.core_type = #tpu.core_type<tc>, window_params = [{transform_indices = @transform_0, window_bounds = array<i64: 1, 1, 24>}, {transform_indices = @transform_1, window_bounds = array<i64: 1, 1, 24>}, {pipeline_mode = #tpu.pipeline_mode<synchronous>, transform_indices = @transform_2, window_bounds = array<i64: 32, 16>}, {pipeline_mode = #tpu.pipeline_mode<synchronous>, transform_indices = @transform_3, window_bounds = array<i64: 32, 16>}, {pipeline_mode = #tpu.pipeline_mode<synchronous>, transform_indices = @transform_4, window_bounds = array<i64: 1, 32>}, {transform_indices = @transform_5, window_bounds = array<i64: 1, 1, 24>}]} {
    %c0 = arith.constant 0 : index
    %c0_0 = arith.constant 0 : index
    %c0_1 = arith.constant 0 : index
    %0 = vector.load %arg1[%c0, %c0_0, %c0_1] : memref<1x1x24xi32, #tpu.memory_space<vmem>>, vector<1x1x24xi32>
    %1 = vector.shape_cast %0 : vector<1x1x24xi32> to vector<1x24xi32>
    %c0_2 = arith.constant 0 : index
    %c0_3 = arith.constant 0 : index
    %c0_4 = arith.constant 0 : index
    %2 = vector.load %arg2[%c0_2, %c0_3, %c0_4] : memref<1x1x24xi32, #tpu.memory_space<vmem>>, vector<1x1x24xi32>
    %3 = vector.shape_cast %2 : vector<1x1x24xi32> to vector<1x24xi32>
    %4 = tpu.iota {dimensions = array<i32: 0>} : vector<16x24xi32>
    %5 = tpu.iota {dimensions = array<i32: 0>} : vector<16x24xi32>
    %6 = vector.broadcast %1 : vector<1x24xi32> to vector<16x24xi32>
    %7 = arith.cmpi eq, %4, %6 : vector<16x24xi32>
    %8 = arith.extui %7 : vector<16x24xi1> to vector<16x24xi32>
    %9 = arith.sitofp %8 : vector<16x24xi32> to vector<16x24xf32>
    %10 = vector.broadcast %3 : vector<1x24xi32> to vector<16x24xi32>
    %11 = arith.cmpi eq, %5, %10 : vector<16x24xi32>
    %12 = arith.extui %11 : vector<16x24xi1> to vector<16x24xi32>
    %13 = arith.sitofp %12 : vector<16x24xi32> to vector<16x24xf32>
    %c0_5 = arith.constant 0 : index
    %c0_6 = arith.constant 0 : index
    %14 = vector.load %arg3[%c0_5, %c0_6] : memref<32x16xf32, #tpu.memory_space<vmem>>, vector<32x16xf32>
    %cst = arith.constant dense<0.000000e+00> : vector<32x24xf32>
    %15 = tpu.matmul %14, %9, %cst {dimension_numbers = #tpu.dot_dimension_numbers<[1], [0], [0], [1], [0, 0, 1, 1], [], []>} : vector<32x16xf32>, vector<16x24xf32>, vector<32x24xf32> -> vector<32x24xf32>
    %c0_7 = arith.constant 0 : index
    %c0_8 = arith.constant 0 : index
    %16 = vector.load %arg4[%c0_7, %c0_8] : memref<32x16xf32, #tpu.memory_space<vmem>>, vector<32x16xf32>
    %cst_9 = arith.constant dense<0.000000e+00> : vector<32x24xf32>
    %17 = tpu.matmul %16, %13, %cst_9 {dimension_numbers = #tpu.dot_dimension_numbers<[1], [0], [0], [1], [0, 0, 1, 1], [], []>} : vector<32x16xf32>, vector<16x24xf32>, vector<32x24xf32> -> vector<32x24xf32>
    %18 = arith.mulf %15, %17 : vector<32x24xf32>
    %c0_10 = arith.constant 0 : index
    %c0_11 = arith.constant 0 : index
    %19 = vector.load %arg5[%c0_10, %c0_11] : memref<1x32xf32, #tpu.memory_space<vmem>>, vector<1x32xf32>
    %cst_12 = arith.constant dense<0.000000e+00> : vector<1x24xf32>
    %20 = tpu.matmul %19, %18, %cst_12 {dimension_numbers = #tpu.dot_dimension_numbers<[1], [0], [0], [1], [0, 0, 1, 1], [], []>} : vector<1x32xf32>, vector<32x24xf32>, vector<1x24xf32> -> vector<1x24xf32>
    %21 = arith.negf %20 : vector<1x24xf32>
    %22 = math.exp %21 : vector<1x24xf32>
    %cst_13 = arith.constant 1.000000e+00 : f32
    %23 = vector.broadcast %cst_13 : f32 to vector<1x24xf32>
    %24 = arith.addf %23, %22 : vector<1x24xf32>
    %25 = arith.divf %23, %24 : vector<1x24xf32>
    %c0_14 = arith.constant 0 : index
    %c0_15 = arith.constant 0 : index
    %c0_16 = arith.constant 0 : index
    %26 = vector.load %arg6[%c0_14, %c0_15, %c0_16] : memref<1x1x24xf32, #tpu.memory_space<vmem>>, vector<1x1x24xf32>
    %27 = vector.shape_cast %26 : vector<1x1x24xf32> to vector<1x24xf32>
    %28 = vector.shape_cast %25 : vector<1x24xf32> to vector<1x1x24xf32>
    tpu.vector_store %arg6[%c0_14, %c0_15, %c0_16], %28 {strides = array<i32>} : memref<1x1x24xf32, #tpu.memory_space<vmem>>, vector<1x1x24xf32>,
    return
  }
  func.func @transform_0(%arg0: i32) -> (i32, i32, i32) {
    %c0_i32 = arith.constant 0 : i32
    %c0_i32_0 = arith.constant 0 : i32
    %c0_i32_1 = arith.constant 0 : i32
    return %arg0, %c0_i32, %c0_i32_0 : i32, i32, i32
  }
  func.func @transform_1(%arg0: i32) -> (i32, i32, i32) {
    %c0_i32 = arith.constant 0 : i32
    %c0_i32_0 = arith.constant 0 : i32
    %c0_i32_1 = arith.constant 0 : i32
    return %arg0, %c0_i32, %c0_i32_0 : i32, i32, i32
  }
  func.func @transform_2(%arg0: i32) -> (i32, i32) {
    %c0_i32 = arith.constant 0 : i32
    %c0_i32_0 = arith.constant 0 : i32
    %c0_i32_1 = arith.constant 0 : i32
    return %c0_i32, %c0_i32_0 : i32, i32
  }
  func.func @transform_3(%arg0: i32) -> (i32, i32) {
    %c0_i32 = arith.constant 0 : i32
    %c0_i32_0 = arith.constant 0 : i32
    %c0_i32_1 = arith.constant 0 : i32
    return %c0_i32, %c0_i32_0 : i32, i32
  }
  func.func @transform_4(%arg0: i32) -> (i32, i32) {
    %c0_i32 = arith.constant 0 : i32
    %c0_i32_0 = arith.constant 0 : i32
    %c0_i32_1 = arith.constant 0 : i32
    return %c0_i32, %c0_i32_0 : i32, i32
  }
  func.func @transform_5(%arg0: i32) -> (i32, i32, i32) {
    %c0_i32 = arith.constant 0 : i32
    %c0_i32_0 = arith.constant 0 : i32
    %c0_i32_1 = arith.constant 0 : i32
    return %arg0, %c0_i32, %c0_i32_0 : i32, i32, i32
  }
}

</mosaic_0001>

<bundles_post_ra>
// kernel: tpu_custom_call.1
= control target key start
LH: loop header
LB: loop body
LE: loop exit
PB: predicated region body
PF: predicated region fallthrough
CT: control target
= control target key end

     0   :  { %v23_v0 = vlaneseq  ;;  %vm50_vm0 = vcmask 130048   ;;  %s553_s0 = inlined_call_operand.vmem [shape: s32[1,1,24], index: 0, kind: input, shape index: {}]   ;;  %s554_s1 = inlined_call_operand.vmem [shape: s32[1,1,24], index: 1, kind: input, shape index: {}]   ;;  %s555_s2 = inlined_call_operand.vmem [shape: f32[32,16], index: 2, kind: input, shape index: {}]   ;;  %s556_s3 = inlined_call_operand.vmem [shape: f32[32,16], index: 3, kind: input, shape index: {}]   ;;  %s557_s4 = inlined_call_operand.vmem [shape: f32[1,32], index: 4, kind: input, shape index: {}]   ;;  %s558_s5 = inlined_call_operand.hbm [shape: f32[1,1,24], index: 5, kind: output, shape index: {}]  }
   0x1   :  { %v350_v1 = vld [vmem:[%s553_s0] ss:$0 sm:$0xff] }
   0x2   :  { %v46_v2 = vld [vmem:[%s555_s2] sm:$0xff]  ;;  %v24_v4 = vshrl.u32 %v23_v0, 7 }
   0x3   :  { %v148_v3 = vld [vmem:[%s556_s3] sm:$0xff]  ;;  %391 = vmatprep.mubr.msk.f32.mxu0 %vm50_vm0, %v46_v2 }
   0x4   :  { %v353_v5 = vld [vmem:[%s554_s1] ss:$0 sm:$0xff]  ;;  %401 = vmatprep.mubr.msk.f32.mxu1 %vm50_vm0, %v148_v3 }
   0x5   :  { %10 = vsyncpa [#allocation3], 0  ;;  %v25_v6 = vadd.s32 8, %v24_v4  ;;  %vm30_vm1 = vcmp.eq.s32.totalorder %v24_v4, %v350_v1  ;;  %vm40_vm2 = vcmp.eq.s32.totalorder %v24_v4, %v353_v5  ;;  %v465_v7 = vmov 1.0|1.0   ;;  %v47_v8 = vld [vmem:[%s555_s2 + $0x8] sm:$0xff] }
   0x6   :  { %v149_v9 = vld [vmem:[%s556_s3 + $0x8] sm:$0xff]  ;;  %v48_v10 = vld [vmem:[%s555_s2 + $0x10] sm:$0xff]  ;;  %v49_v12 = vld [vmem:[%s555_s2 + $0x18] sm:$0xff]  ;;  %v466_v14 = vmov 0.0|0.0   ;;  %vm467_vm7 = vmmov 0   ;;  %v468_v15 = vmov 0.0  }
   0x7   :  { %vm31_vm3 = vcmp.eq.s32.totalorder %v25_v6, %v350_v1  ;;  %vm41_vm4 = vcmp.eq.s32.totalorder %v25_v6, %v353_v5  ;;  %v150_v11 = vld [vmem:[%s556_s3 + $0x10] sm:$0xff]  ;;  %v151_v13 = vld [vmem:[%s556_s3 + $0x18] sm:$0xff]  ;;  %v253_v30 = vld [vmem:[%s557_s4] sm:$0x1]  ;;  %vm254_vm8 = vcmask 261120   ;;  %s469_s11 = smov [#allocation2]  }
   0x8   :  { %vm418_vm5 = vmpackc.low %vm31_vm3, %vm30_vm1  ;;  %s342_s12 = sshll.u32 %s469_s11, 4  ;;  %vm334_vm9 = vcmask 188416   ;;  %s343_s12 = int_to_ptr.vmem [resolvable:$true] %s342_s12 }
   0x9   :  { %419 = vmatprep.subr.msk.bf16.mxu0 %vm418_vm5, %v465_v7  ;;  %vm422_vm6 = vmpackc.low %vm41_vm4, %vm40_vm2  ;;  %s441_s13 = scalar_lea.vmem %s343_s12, 16  ;;  %s445_s14 = scalar_lea.vmem %s343_s12, 32 }
   0xa   :  { %423 = vmatprep.subr.msk.bf16.mxu1 %vm422_vm6, %v465_v7  ;;  %421 = vmatpush3.bf16.msk.msra.mxu0 %vm418_vm5, %v465_v7  ;;  %p442_p0 = scmp.ne.s32.totalorder %s343_s12, %s441_s13  ;;  %p446_p1 = scmp.lt.s32.totalorder %s343_s12, %s343_s12 }
   0xb   :  { %425 = vmatpush3.bf16.msk.msra.mxu1 %vm422_vm6, %v465_v7  ;;  %426 = vmatprep.subr.bf16.mxu0 %v466_v14  ;;  %p447_p2 = scmp.lt.s32.totalorder %s445_s14, %s441_s13 }
   0xd   :  { %392 = vmatmul.mubr.msk.f32.vlgmr.msra.gmra.mrb[0].mxu0 %vm50_vm0, %v47_v8  ;;  %p448_p3 = por %p447_p2, %p446_p1 }
   0xe   :  { %402 = vmatmul.mubr.msk.f32.vlgmr.msra.gmra.mrb[0].mxu1 %vm50_vm0, %v149_v9  ;;  %394 = vmatprep.mubr.msk.f32.mxu0 %vm50_vm0, %v48_v10 }
   0xf   :  { %404 = vmatprep.mubr.msk.f32.mxu1 %vm50_vm0, %v150_v11  ;;  %p449_p4 = pnand %p448_p3, %p442_p0 }
  0x11   :  { %395 = vmatmul.mubr.msk.f32.gmra.mrb[2].mxu0 %vm50_vm0, %v49_v12 }
  0x12   :  { %405 = vmatmul.mubr.msk.f32.gmra.mrb[2].mxu1 %vm50_vm0, %v151_v13  ;;  %415 = vmatprep.mubr.msk.f32.mxu0 %vm467_vm7, %v468_v15 }
  0xe0   :  { %v393_v16 = vpop.f32.mrb[0].mxu0 }
  0xe1   :  { %v403_v17 = vpop.f32.mrb[0].mxu1  ;;  %v129_v18 = vpop.f32.mrb[1].mxu0 }
  0xe2   :  { %v250_v19 = vmul.f32 %v403_v17, %v393_v16  ;;  %v230_v20 = vpop.f32.mrb[1].mxu1 }
  0xe3   :  { %v249_v21 = vmul.f32 %v230_v20, %v129_v18 }
  0xe4   :  { %v396_v22 = vpop.f32.mrb[2].mxu0 }
  0xe5   :  { %v427_v23 = vpack.c.bf16 %v250_v19, %v249_v21  ;;  %v406_v24 = vpop.f32.mrb[2].mxu1  ;;  %v139_v25 = vpop.f32.mrb[3].mxu0 }
  0xe6   :  { %v252_v26 = vmul.f32 %v406_v24, %v396_v22  ;;  %v240_v27 = vpop.f32.mrb[3].mxu1 }
  0xe7   :  { %v251_v28 = vmul.f32 %v240_v27, %v139_v25  ;;  %428 = vmatpush3.bf16.msra.mxu0 %v427_v23 }
  0xe8   :  { %429 = vmatprep.subr.bf16.mxu0 %v466_v14 }
  0xe9   :  { %v430_v29 = vpack.c.bf16 %v252_v26, %v251_v28 }
  0xeb   :  { %431 = vmatpush3.bf16.msra.mxu0 %v430_v29 }
  0xee   :  { %416 = vmatmul.mubr.msk.f32.vlgmr.msra.gmra.mrb[4].mxu0 %vm254_vm8, %v253_v30 }
 0x1c1   :  { %v324_v31 = vpop.f32.mrb[4].mxu0 }
 0x1c2   :  { %v369_v32 = vmul.f32 -1.442695, %v324_v31  ;;  %v417_v33 = vpop.f32.mrb[5].mxu0 }
 0x1c4   :  { %437 = vpow2.f32 %v369_v32 }
 0x1ce   :  { %v438_v34 = vpop.eup %437 }
 0x1cf   :  { %v331_v35 = vadd.f32 1.0, %v438_v34 }
 0x1d1   :  { %439 = vrcp.f32 %v331_v35 }
 0x1db   :  { %v440_v36 = vpop.eup %439 }
 0x1dc   :  { %335 = vst.msk [vmem:[#allocation2] sm:$0x1] %vm334_vm9, %v440_v36 }
 0x1dd   :  { %452 = shalt.err (!%p449_p4)
}
 0x1de   :  { %s453_s16 = scalar_lea.hbm %s558_s5, 16 }
 0x1df   :  { %p454_p5 = scmp.ne.s32.totalorder %s558_s5, %s453_s16  ;;  %p457_p6 = scmp.lt.u32.totalorder %s453_s16, %s558_s5 }
 0x1e1   :  { %p459_p7 = pnand %p457_p6, %p454_p5 }
 0x1e3   :  { %462 = shalt.err (!%p459_p7)
}
 0x1e4   :  { %345 = dma.vmem_to_hbm [thread:$0]  %s343_s12, 16, %s558_s5, [#allocation3]  }
 0x1e5   :  { %463 = dma.done.wait [#allocation3], 16  }
 0x1e6   :  { %464 = vsyncadd [#allocation3], 4294967280 }
 0x1e7   :  { %349 = vsyncpa [#allocation3], 1 }

</bundles_post_ra>
